<compile_context>
chip_gen: v7x
topology: tpu7x:2x2x1
jax: 0.10.0
libtpu: 0.0.40
codegen_flags: <defaults>
</compile_context>

<pallas_src>
import math

import numpy as np
import jax
import jax.numpy as jnp
from jax import lax
from jax.experimental import pallas as pl
from jax.experimental.pallas import tpu as pltpu

D_MODEL = 10
N_HEADS = 2
HEAD_DIM = D_MODEL // N_HEADS
SCALE = 1.0 / math.sqrt(HEAD_DIM)

# TODO(synk): `args.big` is undefined in the source (argparse declares no --big);
# fixed deterministically to 100.0 here.
BIG = 100.0


# ----------------------------------------------------------------------------
# Weights (PyTorch (out_features, in_features) convention), exactly as in spec.
# Used only by the pure-JAX reference; the kernel folds them analytically.
# ----------------------------------------------------------------------------
def _torch_weights():
    f = np.float32
    W = {}
    W["win1"] = np.array([[0] * 10] * 10 + [[0] * 10] * 10 +
                         [[0, 1, 0, 0, 0, 0, 0, 0, 0, 0],
                          [0, 0, 1, 0, 0, 0, 0, 0, 0, 0]] + [[0] * 10] * 8, dtype=f)
    W["bin1"] = np.zeros((30,), f)
    W["wout1"] = np.array([[0] * 10] * 5 +
                          [[1, 0, 0, 0, 0, 0, 0, 0, 0, 0],
                           [0, 1, 0, 0, 0, 0, 0, 0, 0, 0]] + [[0] * 10] * 3, dtype=f)
    W["bout1"] = np.zeros((10,), f)
    W["w11"] = np.array([[0, 0, 0, -1, 0, 1, -1, 0, 0, 0],
                         [0, 0, 0, -1, 0, 1, 0, 0, 0, 0],
                         [0, 0, 0, -1, 0, 1, 1, 0, 0, 0]], dtype=f)
    W["b11"] = np.zeros((3,), f)
    W["w21"] = np.array([[0, 0, 0]] * 7 + [[1, -2, 1], [0, 0, 0], [0, 0, 0]], dtype=f)
    W["b21"] = np.zeros((10,), f)
    W["win2"] = np.array([[0, 0, BIG, 0, 0, 0, 0, 0, 0, 0]] + [[0] * 10] * 4 +
                         [[0, 0, BIG, 0, 0, 0, 0, 0, 0, 0]] + [[0] * 10] * 4 +
                         [[0, 0, 0, 0, 1, 0, 0, 0, 0, 0]] + [[0] * 10] * 4 +
                         [[0, 0, 0, 0, -1, 0, 0, 0, 0, 0]] + [[0] * 10] * 4 +
                         [[0, 0, 0, 0, 0, 0, 0, 1, 0, 0]] + [[0] * 10] * 4 +
                         [[0, 0, 0, 0, 0, 0, 0, 1, 0, 0]] + [[0] * 10] * 4, dtype=f)
    W["bin2"] = np.zeros((30,), f)
    W["wout2"] = np.array([[0] * 10] * 8 +
                          [[-1, 0, 0, 0, 0, 1, 0, 0, 0, 0], [0] * 10], dtype=f)
    W["bout2"] = np.zeros((10,), f)
    W["w12"] = np.zeros((3, 10), f)
    W["b12"] = np.zeros((3,), f)
    W["w22"] = np.zeros((10, 3), f)
    W["b22"] = np.zeros((10,), f)
    W["wo"] = np.array([[0, 0, 0, 0, 0, 0, 0, 0, 1, 0]], dtype=f)
    W["bo"] = np.array([0.0], dtype=f)
    return W


# ----------------------------------------------------------------------------
# Kernel: exact algebraic folding of the constant-weight transformer forward.
#
# Derivation (every weight above is a compile-time constant):
#   embedding : x[:, t] = 1 for token t in {0,1,2};  PE: x[:,3] = k/n,
#               x[:,4] = cos(k*pi) which equals (-1)^k exactly in float32.
#   layer-1 attn : Wq = Wk = 0 -> all scores are exactly 0 -> softmax is the
#               exact uniform 1/n; Wv selects columns 1 and 2; out-proj writes
#               col5 += mean(x[:,1]),  col6 += mean(x[:,2]).  All biases = 0.
#   layer-1 FFN : hidden = relu(col5 - col3  -/0/+  col6);
#               col7 += h0 - 2*h1 + h2.
#   layer-2 attn : per-head q = BIG*col2 (scaled), k = +/- col4, v = col7;
#               out-proj row 8 -> col8 += head1 - head0.
#   layer-2 FFN : all weights zero -> exact no-op.
#   output    : z = y[-1] @ e8 + 0  =  col8 at the last position.
# Only y[-1, 8] reaches the scalar output, so layer-2 attention is evaluated
# for the last query row only (exact dead-code elimination). The script
# validates this against the FULL un-simplified reference below.
# ----------------------------------------------------------------------------
def _parity_kernel(w_ref, z_ref):
    n = w_ref.shape[0]
    tok = w_ref[...]                                            # (n, 1) int32

    # --- embedding columns that are actually consumed downstream ------------
    c1 = (tok == 1).astype(jnp.float32)                         # x[:, 1]
    c2 = (tok == 2).astype(jnp.float32)                         # x[:, 2]
    pos = lax.broadcasted_iota(jnp.int32, (n, 1), 0)
    col3 = pos.astype(jnp.float32) * jnp.float32(1.0 / n)       # PE col3 = k/n
    col4 = jnp.where(jnp.bitwise_and(pos, 1) == 0, 1.0, -1.0)   # cos(k*pi) == (-1)^k

    # --- layer-1 attention: scores are exactly 0 -> uniform weights ---------
    inv_n = jnp.float32(1.0 / n)
    col5 = jnp.sum(c1, axis=0, keepdims=True) * inv_n           # (1,1) mean(x[:,1])
    col6 = jnp.sum(c2, axis=0, keepdims=True) * inv_n           # (1,1) mean(x[:,2])

    # --- layer-1 FFN -> residual into column 7 ------------------------------
    base = col5 - col3                                          # (n,1)
    h0 = jnp.maximum(base - col6, 0.0)
    h1 = jnp.maximum(base, 0.0)
    h2 = jnp.maximum(base + col6, 0.0)
    col7 = (h0 + h2) - 2.0 * h1                                 # (n,1)

    # --- layer-2 attention (last query row only; v = col7 for both heads) ---
    q = (c2[n - 1:n, :] * jnp.float32(BIG)) * jnp.float32(SCALE)  # (1,1)
    s0 = q * col4                                               # (n,1) head-0 scores

    def attend(s):
        m = jnp.max(s, axis=0, keepdims=True)                   # BIG saturates -> keep max-sub
        e = jnp.exp(s - m)
        p = e * pl.reciprocal(jnp.sum(e, axis=0, keepdims=True), approx=False)
        return jnp.sum(p * col7, axis=0, keepdims=True)         # (1,1)

    head0 = attend(s0)
    head1 = attend(-s0)                                         # head-1 keys are negated

    # out-proj row 8 = [-1,0,0,0,0,1,0,0,0,0]; col8 was exactly 0 before this
    # layer; output layer is the e8 selector with zero bias.
    z_ref[...] = head1 - head0


def model_forward(w):
    """w: (n,) int token ids over {0,1,2}. Returns z of shape (1,)."""
    n = int(w.shape[0])
    z = pl.pallas_call(
        _parity_kernel,
        out_shape=jax.ShapeDtypeStruct((1, 1), jnp.float32),
        in_specs=[pl.BlockSpec(memory_space=pltpu.MemorySpace.VMEM)],
        out_specs=pl.BlockSpec(memory_space=pltpu.MemorySpace.VMEM),
    )(w.reshape(n, 1).astype(jnp.int32))
    return z.reshape((1,))


# ----------------------------------------------------------------------------
# Pure-JAX reference: FULL un-simplified forward (both FFNs, all biases,
# cos() positional encoding) — validates every folding in the kernel.
# ----------------------------------------------------------------------------
def _embed_ref(w):
    n = w.shape[0]
    emb = jnp.eye(3, D_MODEL, dtype=jnp.float32)[w]
    pos = jnp.arange(n, dtype=jnp.float32)
    zero = jnp.zeros((n,), jnp.float32)
    pe = jnp.stack([zero] * 3 + [pos / n, jnp.cos(pos * math.pi)] + [zero] * 5, axis=1)
    return emb + pe


def reference_forward(w, W):
    x = _embed_ref(w)

    def enc_layer(x, win, bin_, wout, bout, w1, b1, w2, b2):
        qkv = x @ win.T + bin_
        q = qkv[:, 0:D_MODEL]
        k = qkv[:, D_MODEL:2 * D_MODEL]
        v = qkv[:, 2 * D_MODEL:3 * D_MODEL]
        heads = []
        for h in range(N_HEADS):
            lo, hi = h * HEAD_DIM, (h + 1) * HEAD_DIM
            s = (q[:, lo:hi] * SCALE) @ k[:, lo:hi].T
            p = jax.nn.softmax(s, axis=-1)
            heads.append(p @ v[:, lo:hi])
        attn = jnp.concatenate(heads, axis=1) @ wout.T + bout
        x = x + attn
        ff = jnp.maximum(x @ w1.T + b1, 0.0) @ w2.T + b2
        return x + ff

    x = enc_layer(x, W["win1"], W["bin1"], W["wout1"], W["bout1"],
                  W["w11"], W["b11"], W["w21"], W["b21"])
    x = enc_layer(x, W["win2"], W["bin2"], W["wout2"], W["bout2"],
                  W["w12"], W["b12"], W["w22"], W["b22"])
    z = x[-1:, :] @ W["wo"].T + W["bo"]
    return z.reshape((1,))


_WEIGHTS = _torch_weights()


if __name__ == "__main__":
    key = jax.random.PRNGKey(0)
    # tokens over the vocabulary {0, 1, 2} (word_embedding is eye(3, 10)); seq = 8
    w = jax.random.randint(key, (8,), 0, 3)

    z = model_forward(w)
    jax.block_until_ready(z)

    z_ref = reference_forward(w, _WEIGHTS)
    assert z.shape == (1,)
    assert jnp.allclose(z, z_ref, atol=1e-5, rtol=1e-5), (z, z_ref)
    print("KERNEL_OK")
</pallas_src>

<mosaic_0001>
module attributes {stable_mosaic.version = 11 : i64} {
  func.func @_parity_kernel(%arg0: memref<8x1xi32, #tpu.memory_space<vmem>>, %arg1: memref<1x1xf32, #tpu.memory_space<vmem>>) attributes {dimension_semantics = [], scalar_prefetch = 0 : i64, scratch_operands = 0 : i64, tpu.core_type = #tpu.core_type<tc>} {
    %c0 = arith.constant 0 : index
    %c0_0 = arith.constant 0 : index
    %0 = vector.load %arg0[%c0, %c0_0] : memref<8x1xi32, #tpu.memory_space<vmem>>, vector<8x1xi32>
    %c1_i32 = arith.constant 1 : i32
    %1 = vector.broadcast %c1_i32 : i32 to vector<8x1xi32>
    %2 = arith.cmpi eq, %0, %1 : vector<8x1xi32>
    %3 = arith.extui %2 : vector<8x1xi1> to vector<8x1xi32>
    %4 = arith.sitofp %3 : vector<8x1xi32> to vector<8x1xf32>
    %c2_i32 = arith.constant 2 : i32
    %5 = vector.broadcast %c2_i32 : i32 to vector<8x1xi32>
    %6 = arith.cmpi eq, %0, %5 : vector<8x1xi32>
    %7 = arith.extui %6 : vector<8x1xi1> to vector<8x1xi32>
    %8 = arith.sitofp %7 : vector<8x1xi32> to vector<8x1xf32>
    %9 = tpu.iota {dimensions = array<i32: 0>} : vector<8x1xi32>
    %10 = arith.sitofp %9 : vector<8x1xi32> to vector<8x1xf32>
    %cst = arith.constant 1.250000e-01 : f32
    %11 = vector.broadcast %cst : f32 to vector<8x1xf32>
    %12 = arith.mulf %10, %11 : vector<8x1xf32>
    %c1_i32_1 = arith.constant 1 : i32
    %13 = vector.broadcast %c1_i32_1 : i32 to vector<8x1xi32>
    %14 = arith.andi %9, %13 : vector<8x1xi32>
    %c0_i32 = arith.constant 0 : i32
    %15 = vector.broadcast %c0_i32 : i32 to vector<8x1xi32>
    %16 = arith.cmpi eq, %14, %15 : vector<8x1xi32>
    %cst_2 = arith.constant 1.000000e+00 : f32
    %cst_3 = arith.constant -1.000000e+00 : f32
    %17 = vector.broadcast %cst_2 : f32 to vector<8x1xf32>
    %18 = vector.broadcast %cst_3 : f32 to vector<8x1xf32>
    %19 = arith.select %16, %17, %18 : vector<8x1xi1>, vector<8x1xf32>
    %cst_4 = arith.constant dense<0.000000e+00> : vector<1xf32>
    %20 = vector.multi_reduction <add>, %4, %cst_4 [0] : vector<8x1xf32> to vector<1xf32>
    %21 = vector.shape_cast %20 : vector<1xf32> to vector<1x1xf32>
    %cst_5 = arith.constant 1.250000e-01 : f32
    %22 = vector.broadcast %cst_5 : f32 to vector<1x1xf32>
    %23 = arith.mulf %21, %22 : vector<1x1xf32>
    %cst_6 = arith.constant dense<0.000000e+00> : vector<1xf32>
    %24 = vector.multi_reduction <add>, %8, %cst_6 [0] : vector<8x1xf32> to vector<1xf32>
    %25 = vector.shape_cast %24 : vector<1xf32> to vector<1x1xf32>
    %cst_7 = arith.constant 1.250000e-01 : f32
    %26 = vector.broadcast %cst_7 : f32 to vector<1x1xf32>
    %27 = arith.mulf %25, %26 : vector<1x1xf32>
    %28 = vector.broadcast %23 : vector<1x1xf32> to vector<8x1xf32>
    %29 = arith.subf %28, %12 : vector<8x1xf32>
    %30 = vector.broadcast %27 : vector<1x1xf32> to vector<8x1xf32>
    %31 = arith.subf %29, %30 : vector<8x1xf32>
    %cst_8 = arith.constant 0.000000e+00 : f32
    %32 = vector.broadcast %cst_8 : f32 to vector<8x1xf32>
    %33 = arith.maximumf %31, %32 : vector<8x1xf32>
    %cst_9 = arith.constant 0.000000e+00 : f32
    %34 = vector.broadcast %cst_9 : f32 to vector<8x1xf32>
    %35 = arith.maximumf %29, %34 : vector<8x1xf32>
    %36 = vector.broadcast %27 : vector<1x1xf32> to vector<8x1xf32>
    %37 = arith.addf %29, %36 : vector<8x1xf32>
    %cst_10 = arith.constant 0.000000e+00 : f32
    %38 = vector.broadcast %cst_10 : f32 to vector<8x1xf32>
    %39 = arith.maximumf %37, %38 : vector<8x1xf32>
    %40 = arith.addf %33, %39 : vector<8x1xf32>
    %cst_11 = arith.constant 2.000000e+00 : f32
    %41 = vector.broadcast %cst_11 : f32 to vector<8x1xf32>
    %42 = arith.mulf %41, %35 : vector<8x1xf32>
    %43 = arith.subf %40, %42 : vector<8x1xf32>
    %44 = vector.extract_strided_slice %8 {offsets = [7, 0], sizes = [1, 1], strides = [1, 1]} : vector<8x1xf32> to vector<1x1xf32>
    %cst_12 = arith.constant 1.000000e+02 : f32
    %45 = vector.broadcast %cst_12 : f32 to vector<1x1xf32>
    %46 = arith.mulf %44, %45 : vector<1x1xf32>
    %cst_13 = arith.constant 0.44721359 : f32
    %47 = vector.broadcast %cst_13 : f32 to vector<1x1xf32>
    %48 = arith.mulf %46, %47 : vector<1x1xf32>
    %49 = vector.broadcast %48 : vector<1x1xf32> to vector<8x1xf32>
    %50 = arith.mulf %49, %19 : vector<8x1xf32>
    %cst_14 = arith.constant dense<0xFF800000> : vector<1xf32>
    %51 = vector.multi_reduction <maximumf>, %50, %cst_14 [0] : vector<8x1xf32> to vector<1xf32>
    %52 = vector.shape_cast %51 : vector<1xf32> to vector<1x1xf32>
    %53 = vector.broadcast %52 : vector<1x1xf32> to vector<8x1xf32>
    %54 = arith.subf %50, %53 : vector<8x1xf32>
    %55 = math.exp %54 : vector<8x1xf32>
    %cst_15 = arith.constant dense<0.000000e+00> : vector<1xf32>
    %56 = vector.multi_reduction <add>, %55, %cst_15 [0] : vector<8x1xf32> to vector<1xf32>
    %57 = vector.shape_cast %56 : vector<1xf32> to vector<1x1xf32>
    %58 = tpu.reciprocal %57 : vector<1x1xf32> -> vector<1x1xf32>
    %59 = vector.broadcast %58 : vector<1x1xf32> to vector<8x1xf32>
    %60 = arith.mulf %55, %59 : vector<8x1xf32>
    %61 = arith.mulf %60, %43 : vector<8x1xf32>
    %cst_16 = arith.constant dense<0.000000e+00> : vector<1xf32>
    %62 = vector.multi_reduction <add>, %61, %cst_16 [0] : vector<8x1xf32> to vector<1xf32>
    %63 = vector.shape_cast %62 : vector<1xf32> to vector<1x1xf32>
    %cst_17 = arith.constant 0.000000e+00 : f32
    %64 = vector.broadcast %cst_17 : f32 to vector<8x1xf32>
    %65 = arith.subf %64, %50 : vector<8x1xf32>
    %cst_18 = arith.constant dense<0xFF800000> : vector<1xf32>
    %66 = vector.multi_reduction <maximumf>, %65, %cst_18 [0] : vector<8x1xf32> to vector<1xf32>
    %67 = vector.shape_cast %66 : vector<1xf32> to vector<1x1xf32>
    %68 = vector.broadcast %67 : vector<1x1xf32> to vector<8x1xf32>
    %69 = arith.subf %65, %68 : vector<8x1xf32>
    %70 = math.exp %69 : vector<8x1xf32>
    %cst_19 = arith.constant dense<0.000000e+00> : vector<1xf32>
    %71 = vector.multi_reduction <add>, %70, %cst_19 [0] : vector<8x1xf32> to vector<1xf32>
    %72 = vector.shape_cast %71 : vector<1xf32> to vector<1x1xf32>
    %73 = tpu.reciprocal %72 : vector<1x1xf32> -> vector<1x1xf32>
    %74 = vector.broadcast %73 : vector<1x1xf32> to vector<8x1xf32>
    %75 = arith.mulf %70, %74 : vector<8x1xf32>
    %76 = arith.mulf %75, %43 : vector<8x1xf32>
    %cst_20 = arith.constant dense<0.000000e+00> : vector<1xf32>
    %77 = vector.multi_reduction <add>, %76, %cst_20 [0] : vector<8x1xf32> to vector<1xf32>
    %78 = vector.shape_cast %77 : vector<1xf32> to vector<1x1xf32>
    %79 = arith.subf %78, %63 : vector<1x1xf32>
    %c0_21 = arith.constant 0 : index
    %c0_22 = arith.constant 0 : index
    %80 = vector.load %arg1[%c0_21, %c0_22] : memref<1x1xf32, #tpu.memory_space<vmem>>, vector<1x1xf32>
    tpu.vector_store %arg1[%c0_21, %c0_22], %79 {strides = array<i32>} : memref<1x1xf32, #tpu.memory_space<vmem>>, vector<1x1xf32>,
    return
  }
}

</mosaic_0001>

<bundles_post_ra>
// kernel: tpu_custom_call.1
= control target key start
LH: loop header
LB: loop body
LE: loop exit
PB: predicated region body
PF: predicated region fallthrough
CT: control target
= control target key end

     0   :  { %v16_v1 = vlaneseq  ;;  %s201_s0 = inlined_call_operand.vmem [shape: s32[8,1], index: 0, kind: input, shape index: {}]   ;;  %s202_s1 = inlined_call_operand.hbm [shape: f32[1,1], index: 1, kind: output, shape index: {}]  }
   0x1   :  { %v9_v0 = vld [vmem:[%s201_s0] sm:$0xff] }
   0x2   :  { %6 = vsyncpa [#allocation3], 0  ;;  %vm13_vm0 = vcmp.eq.s32.totalorder %v9_v0, 2  ;;  %v165_v2 = vmov 0.0   ;;  %v17_v4 = vshrl.u32 %v16_v1, 7  ;;  %v166_v9 = vmov -1.0  }
   0x3   :  { %v129_v3 = vsel %vm13_vm0, 1.0, %v165_v2  ;;  %vm10_vm2 = vcmp.eq.s32.totalorder %v9_v0, 1  ;;  %vm23_vm3 = vcmask 7168   ;;  %s167_s0 = smov [#allocation2]   ;;  %vm112_vm4 = vcmask 0  }
   0x4   :  { %v49_v5 = vmul.f32 100.0, %v129_v3  ;;  %v20_v6 = vand.u32 1, %v17_v4  ;;  %v53_v8 = vsub.s32 7, %v17_v4  ;;  %v128_v13 = vsel %vm10_vm2, 1.0, %v165_v2  ;;  %s120_s8 = sshll.u32 %s167_s0, 4  ;;  %s121_s8 = int_to_ptr.vmem [resolvable:$true] %s120_s8 }
   0x5   :  { %v24_v18 = vsel %vm23_vm3, %v128_v13, 0.0  ;;  %v32_v24 = vsel %vm23_vm3, %v129_v3, 0.0  ;;  %v18_v44 = vcvt.s32.f32 %v17_v4  ;;  %s141_s9 = scalar_lea.vmem %s121_s8, 16  ;;  %s145_s10 = scalar_lea.vmem %s121_s8, 32 }
   0x6   :  { %v50_v7 = vmul.f32 0.4472136, %v49_v5  ;;  %vm21_vm1 = vcmp.eq.s32.totalorder %v20_v6, 0  ;;  %v25_v23 = vrot.slane %v24_v18, 4  ;;  %v33_v29 = vrot.slane %v32_v24, 4  ;;  %p142_p0 = scmp.ne.s32.totalorder %s121_s8, %s141_s9  ;;  %p146_p1 = scmp.lt.s32.totalorder %s121_s8, %s121_s8 }
   0x7   :  { %v22_v10 = vsel %vm21_vm1, 1.0, %v166_v9  ;;  %v19_v51 = vmul.f32 0.125, %v18_v44  ;;  %p147_p2 = scmp.lt.s32.totalorder %s145_s10, %s141_s9 }
   0x8   :  { %v54_v11 = vrot.slane %v50_v7, %v53_v8  ;;  %v26_v28 = vadd.f32 %v25_v23, %v24_v18  ;;  %v34_v35 = vadd.f32 %v33_v29, %v32_v24 }
   0x9   :  { %p148_p3 = por %p147_p2, %p146_p1 }
   0xa   :  { %v55_v12 = vmul.f32 %v54_v11, %v22_v10  ;;  %v27_v34 = vrot.slane %v26_v28, 2  ;;  %v35_v40 = vrot.slane %v34_v35, 2 }
   0xb   :  { %p149_p4 = pnand %p148_p3, %p142_p0 }
   0xc   :  { %v56_v14 = vsel %vm23_vm3, %v55_v12, -inf  ;;  %v83_v15 = vsub.f32 0.0, %v55_v12  ;;  %v28_v39 = vadd.f32 %v27_v34, %v26_v28  ;;  %v36_v43 = vadd.f32 %v35_v40, %v34_v35 }
   0xd   :  { %v57_v16 = vrot.slane %v56_v14, 4 }
   0xe   :  { %v84_v17 = vsel %vm23_vm3, %v83_v15, -inf  ;;  %v29_v42 = vrot.slane %v28_v39, 1  ;;  %v37_v46 = vrot.slane %v36_v43, 1 }
   0xf   :  { %v58_v19 = vmax.f32 %v56_v14, %v57_v16  ;;  %v85_v20 = vrot.slane %v84_v17, 4 }
  0x10   :  { %v30_v45 = vadd.f32 %v29_v42, %v28_v39  ;;  %v38_v53 = vadd.f32 %v37_v46, %v36_v43 }
  0x11   :  { %v59_v21 = vrot.slane %v58_v19, 2  ;;  %v86_v22 = vmax.f32 %v84_v17, %v85_v20 }
  0x12   :  { %v31_v52 = vmul.f32 0.125, %v30_v45  ;;  %v39_v58 = vmul.f32 0.125, %v38_v53 }
  0x13   :  { %v60_v25 = vmax.f32 %v58_v19, %v59_v21  ;;  %v87_v26 = vrot.slane %v86_v22, 2 }
  0x14   :  { %v40_v59 = vsub.f32 %v31_v52, %v19_v51 }
  0x15   :  { %v61_v27 = vrot.slane %v60_v25, 1  ;;  %v88_v30 = vmax.f32 %v86_v22, %v87_v26 }
  0x16   :  { %v41_v0 = vsub.f32 %v40_v59, %v39_v58  ;;  %v44_v1 = vadd.f32 %v40_v59, %v39_v58  ;;  %v43_v6 = vmax.f32 %v40_v59, 0.0 }
  0x17   :  { %v62_v31 = vmax.f32 %v60_v25, %v61_v27  ;;  %v89_v32 = vrot.slane %v88_v30, 1 }
  0x18   :  { %v42_v5 = vmax.f32 %v41_v0, 0.0  ;;  %v45_v7 = vmax.f32 %v44_v1, 0.0  ;;  %v47_v10 = vmul.f32 2.0, %v43_v6 }
  0x19   :  { %v63_v33 = vsub.f32 %v55_v12, %v62_v31  ;;  %v90_v36 = vmax.f32 %v88_v30, %v89_v32 }
  0x1a   :  { %v46_v9 = vadd.f32 %v45_v7, %v42_v5 }
  0x1b   :  { %v64_v37 = vmul.f32 1.442695, %v63_v33  ;;  %v91_v38 = vsub.f32 %v83_v15, %v90_v36 }
  0x1c   :  { %v48_v11 = vsub.f32 %v46_v9, %v47_v10 }
  0x1d   :  { %133 = vpow2.f32 %v64_v37  ;;  %v92_v41 = vmul.f32 1.442695, %v91_v38 }
  0x1f   :  { %135 = vpow2.f32 %v92_v41 }
  0x27   :  { %v134_v47 = vpop.eup %133 }
  0x28   :  { %v66_v48 = vsel %vm23_vm3, %v134_v47, 0.0 }
  0x29   :  { %v67_v49 = vrot.slane %v66_v48, 4  ;;  %v136_v50 = vpop.eup %135 }
  0x2a   :  { %v94_v55 = vsel %vm23_vm3, %v136_v50, 0.0 }
  0x2b   :  { %v68_v54 = vadd.f32 %v67_v49, %v66_v48  ;;  %v95_v56 = vrot.slane %v94_v55, 4 }
  0x2d   :  { %v69_v57 = vrot.slane %v68_v54, 2  ;;  %v96_v60 = vadd.f32 %v95_v56, %v94_v55 }
  0x2f   :  { %v70_v61 = vadd.f32 %v69_v57, %v68_v54  ;;  %v97_v62 = vrot.slane %v96_v60, 2 }
  0x31   :  { %v71_v63 = vrot.slane %v70_v61, 1  ;;  %v98_v2 = vadd.f32 %v97_v62, %v96_v60 }
  0x33   :  { %v72_v3 = vadd.f32 %v71_v63, %v70_v61  ;;  %v99_v4 = vrot.slane %v98_v2, 1 }
  0x35   :  { %137 = vrcp.f32 %v72_v3  ;;  %v100_v8 = vadd.f32 %v99_v4, %v98_v2 }
  0x37   :  { %139 = vrcp.f32 %v100_v8 }
  0x3f   :  { %v138_v12 = vpop.eup %137 }
  0x40   :  { %v74_v13 = vmul.f32 %v138_v12, %v134_v47 }
  0x41   :  { %v140_v14 = vpop.eup %139 }
  0x42   :  { %v75_v15 = vmul.f32 %v74_v13, %v48_v11  ;;  %v102_v16 = vmul.f32 %v140_v14, %v136_v50 }
  0x44   :  { %v76_v17 = vsel %vm23_vm3, %v75_v15, 0.0  ;;  %v103_v19 = vmul.f32 %v102_v16, %v48_v11 }
  0x45   :  { %v77_v18 = vrot.slane %v76_v17, 4 }
  0x46   :  { %v104_v21 = vsel %vm23_vm3, %v103_v19, 0.0 }
  0x47   :  { %v78_v20 = vadd.f32 %v77_v18, %v76_v17  ;;  %v105_v22 = vrot.slane %v104_v21, 4 }
  0x49   :  { %v79_v23 = vrot.slane %v78_v20, 2  ;;  %v106_v24 = vadd.f32 %v105_v22, %v104_v21 }
  0x4b   :  { %v80_v25 = vadd.f32 %v79_v23, %v78_v20  ;;  %v107_v26 = vrot.slane %v106_v24, 2 }
  0x4d   :  { %v81_v27 = vrot.slane %v80_v25, 1  ;;  %v108_v28 = vadd.f32 %v107_v26, %v106_v24 }
  0x4f   :  { %v82_v29 = vadd.f32 %v81_v27, %v80_v25  ;;  %v109_v30 = vrot.slane %v108_v28, 1 }
  0x51   :  { %v110_v31 = vadd.f32 %v109_v30, %v108_v28 }
  0x53   :  { %v111_v32 = vsub.f32 %v110_v31, %v82_v29 }
  0x55   :  { %113 = vst.msk [vmem:[#allocation2] sm:$0x1] %vm112_vm4, %v111_v32 }
  0x56   :  { %152 = shalt.err (!%p149_p4)
}
  0x57   :  { %s153_s13 = scalar_lea.hbm %s202_s1, 16 }
  0x58   :  { %p154_p5 = scmp.ne.s32.totalorder %s202_s1, %s153_s13  ;;  %p157_p6 = scmp.lt.u32.totalorder %s153_s13, %s202_s1 }
  0x5a   :  { %p159_p7 = pnand %p157_p6, %p154_p5 }
  0x5c   :  { %162 = shalt.err (!%p159_p7)
}
  0x5d   :  { %123 = dma.vmem_to_hbm [thread:$0]  %s121_s8, 16, %s202_s1, [#allocation3]  }
  0x5e   :  { %163 = dma.done.wait [#allocation3], 16  }
  0x5f   :  { %164 = vsyncadd [#allocation3], 4294967280 }
  0x60   :  { %127 = vsyncpa [#allocation3], 1 }

</bundles_post_ra>
